<compile_context>
chip_gen: v5e
topology: v5e:2x2
jax: 0.10.0
libtpu: 0.0.40
codegen_flags: <defaults>
</compile_context>

<pallas_src>
import math

import jax
import jax.numpy as jnp
from jax.experimental import pallas as pl
from jax.experimental.pallas import tpu as pltpu  # noqa: F401  (TPU backend)

# ----------------------------- configuration -------------------------------
B = 2            # batch
C = 8            # d_model (channels == attention sequence length)
DC = 3           # d_cond
H = 8
W = 8
K = 3            # conv kernel size
HW = H * W       # 64  (attention head dim)
PAD = (K - 1) // 2
TAPS = K * K                 # 9
CIN_PAD = 16                 # C (x) + DC (cond) channels, zero-padded to 16
BHW = B * HW                 # 128  -> exactly one full lane group


# ------------------------------- kernel ------------------------------------
def cam_kernel(p_ref, wyq_ref, byq_ref, wo_ref, bo_ref, out_ref):
    # p_ref  : (TAPS*CIN_PAD, B*HW) fused im2col patches of [x ; cond ; 0],
    #                               batch packed along lanes.
    # wyq_ref: (2C, TAPS*CIN_PAD)   rows 0..C-1 = cnn weight,
    #                               rows C..2C-1 = cnn_cond weight * 1/sqrt(HW)
    # byq_ref: (2C, 1)              [cnn bias ; cnn_cond bias * 1/sqrt(HW)]
    # wo_ref : (HW, HW)             fc_o weight transposed to (in, out)
    # bo_ref : (1, HW)              fc_o bias
    # out_ref: (C, B*HW)            lane-dense packed output [out_b0 | out_b1]

    # Both 3x3 convs for both batch elements in ONE 128-lane MXU matmul.
    yq = jnp.dot(wyq_ref[...], p_ref[...], preferred_element_type=jnp.float32)
    yq = yq + byq_ref[...]
    y = yq[0:C, :]          # keys / values               (C, B*HW)
    q = yq[C:2 * C, :]      # queries, scale pre-folded   (C, B*HW)

    # Per-batch attention on 64-lane slices (static unroll, B = 2).
    for b in range(B):
        yb = y[:, b * HW:(b + 1) * HW]                    # (C, HW)
        qb = q[:, b * HW:(b + 1) * HW]                    # (C, HW)
        # scores = (q @ y^T) / sqrt(HW); scale already folded into q.
        att = jax.lax.dot_general(qb, yb, (((1,), (1,)), ((), ())),
                                  preferred_element_type=jnp.float32)  # (C, C)
        att = att - jnp.max(att, axis=-1, keepdims=True)
        e = jnp.exp(att)
        inv = pl.reciprocal(jnp.sum(e, axis=-1, keepdims=True), approx=True)
        att = e * inv
        # TODO(synk): nn.Dropout(0.1) on att is train-only; eval -> identity.
        ob = jnp.dot(att, yb, preferred_element_type=jnp.float32)      # (C, HW)
        out_ref[:, b * HW:(b + 1) * HW] = (
            jnp.dot(ob, wo_ref[...], preferred_element_type=jnp.float32)
            + bo_ref[...])


# --------------------- hoisted, one-time parameter prep ---------------------
def prepare_params(w_x, b_x, w_c, b_c, w_fc, b_fc):
    """Re-layout module parameters for the kernel. Run once at load time.

    Folds the 1/sqrt(HW) attention scale into the cnn_cond weights/bias and
    stacks both conv weights into a single (2C, TAPS*CIN_PAD) matmul matrix
    (tap-major, channel-minor columns, matching _pack_patches row order)."""
    scale = 1.0 / math.sqrt(HW)
    wyq = jnp.zeros((2 * C, TAPS, CIN_PAD), jnp.float32)
    wyq = wyq.at[0:C, :, 0:C].set(
        jnp.transpose(w_x, (0, 2, 3, 1)).reshape(C, TAPS, C))
    wyq = wyq.at[C:2 * C, :, C:C + DC].set(
        jnp.transpose(w_c, (0, 2, 3, 1)).reshape(C, TAPS, DC) * scale)
    wyq = wyq.reshape(2 * C, TAPS * CIN_PAD)
    byq = jnp.concatenate([b_x, b_c * scale]).reshape(2 * C, 1)
    wo_t = jnp.transpose(w_fc)            # (in, out): kernel does o @ W^T
    bo = b_fc.reshape(1, HW)
    return wyq, byq, wo_t, bo


# ------------------------------ per-call glue -------------------------------
def _pack_patches(x, cond):
    """(B,C,H,W),(B,DC,H,W) -> (TAPS*CIN_PAD, B*HW) fused im2col patches.

    Rows are tap-major / channel-minor over the zero-padded 16-channel stack
    [x ; cond ; 0]; the batch is packed along lanes (B*HW = 128)."""
    z = jnp.zeros((B, CIN_PAD - C - DC, H, W), x.dtype)
    xc = jnp.concatenate([x, cond, z], axis=1)                        # (B,16,H,W)
    xp = jnp.pad(xc, ((0, 0), (0, 0), (PAD, PAD), (PAD, PAD)))
    taps = [xp[:, :, dy:dy + H, dx:dx + W]
            for dy in range(K) for dx in range(K)]
    p = jnp.stack(taps, axis=1).reshape(B, TAPS * CIN_PAD, HW)
    return p.transpose(1, 0, 2).reshape(TAPS * CIN_PAD, BHW)


@jax.jit
def channel_attention_module(x, cond, wyq, byq, wo_t, bo):
    # TODO(synk): im2col could move in-kernel via pltpu.roll + boundary masks
    # to drop the remaining per-call XLA glue; kept in the (XLA-fused) wrapper.
    p = _pack_patches(x, cond)
    out = pl.pallas_call(
        cam_kernel,
        out_shape=jax.ShapeDtypeStruct((C, BHW), jnp.float32),
    )(p, wyq, byq, wo_t, bo)
    return out.reshape(C, B, HW).transpose(1, 0, 2)                   # (B,C,HW)


# ----------------------------- pure-JAX reference ---------------------------
def reference(x, cond, w_x, b_x, w_c, b_c, w_fc, b_fc):
    dn = ("NCHW", "OIHW", "NCHW")
    pad = [(PAD, PAD), (PAD, PAD)]
    y = jax.lax.conv_general_dilated(x, w_x, (1, 1), pad, dimension_numbers=dn)
    y = y + b_x[None, :, None, None]
    yc = jax.lax.conv_general_dilated(cond, w_c, (1, 1), pad,
                                      dimension_numbers=dn)
    yc = yc + b_c[None, :, None, None]
    y = y.reshape(B, C, HW)
    yc = yc.reshape(B, C, HW)
    att = jnp.einsum("bqd,bkd->bqk", yc, y) / math.sqrt(HW)
    att = jax.nn.softmax(att, axis=-1)
    o = jnp.einsum("bqk,bkd->bqd", att, y)
    o = jnp.einsum("bqd,od->bqo", o, w_fc) + b_fc
    return o


# --------------------------------- main --------------------------------------
if __name__ == "__main__":
    key = jax.random.PRNGKey(0)
    k1, k2, k3, k4, k5, k6, k7, k8 = jax.random.split(key, 8)

    # deterministic synthetic parameters (shapes per nn.Module __init__)
    w_x = 0.1 * jax.random.normal(k1, (C, C, K, K), jnp.float32)     # cnn.weight
    b_x = 0.1 * jax.random.normal(k2, (C,), jnp.float32)             # cnn.bias
    w_c = 0.1 * jax.random.normal(k3, (C, DC, K, K), jnp.float32)    # cnn_cond.weight
    b_c = 0.1 * jax.random.normal(k4, (C,), jnp.float32)             # cnn_cond.bias
    w_fc = (1.0 / math.sqrt(HW)) * jax.random.normal(k5, (HW, HW), jnp.float32)
    b_fc = 0.1 * jax.random.normal(k6, (HW,), jnp.float32)           # pa.fc_o.bias

    x = jax.random.normal(k7, (B, C, H, W), jnp.float32)
    cond = jax.random.normal(k8, (B, DC, H, W), jnp.float32)

    params = prepare_params(w_x, b_x, w_c, b_c, w_fc, b_fc)   # hoisted: once
    out = channel_attention_module(x, cond, *params)
    out = jax.block_until_ready(out)

    ref = reference(x, cond, w_x, b_x, w_c, b_c, w_fc, b_fc)
    assert out.shape == (B, C, HW), out.shape
    max_err = float(jnp.max(jnp.abs(out - ref)))
    assert jnp.allclose(out, ref, atol=5e-3, rtol=5e-3), max_err

    print("KERNEL_OK")
</pallas_src>

<mosaic_0001>
module attributes {stable_mosaic.version = 11 : i64} {
  func.func @cam_kernel(%arg0: memref<144x128xf32, #tpu.memory_space<vmem>>, %arg1: memref<16x144xf32, #tpu.memory_space<vmem>>, %arg2: memref<16x1xf32, #tpu.memory_space<vmem>>, %arg3: memref<64x64xf32, #tpu.memory_space<vmem>>, %arg4: memref<1x64xf32, #tpu.memory_space<vmem>>, %arg5: memref<8x128xf32, #tpu.memory_space<vmem>>) attributes {dimension_semantics = [], scalar_prefetch = 0 : i64, scratch_operands = 0 : i64, tpu.core_type = #tpu.core_type<tc>} {
    %c0 = arith.constant 0 : index
    %c0_0 = arith.constant 0 : index
    %0 = vector.load %arg1[%c0, %c0_0] : memref<16x144xf32, #tpu.memory_space<vmem>>, vector<16x144xf32>
    %c0_1 = arith.constant 0 : index
    %c0_2 = arith.constant 0 : index
    %1 = vector.load %arg0[%c0_1, %c0_2] : memref<144x128xf32, #tpu.memory_space<vmem>>, vector<144x128xf32>
    %cst = arith.constant dense<0.000000e+00> : vector<16x128xf32>
    %2 = tpu.matmul %0, %1, %cst {dimension_numbers = #tpu.dot_dimension_numbers<[1], [0], [0], [1], [0, 0, 1, 1], [], []>} : vector<16x144xf32>, vector<144x128xf32>, vector<16x128xf32> -> vector<16x128xf32>
    %c0_3 = arith.constant 0 : index
    %c0_4 = arith.constant 0 : index
    %3 = vector.load %arg2[%c0_3, %c0_4] : memref<16x1xf32, #tpu.memory_space<vmem>>, vector<16x1xf32>
    %4 = vector.broadcast %3 : vector<16x1xf32> to vector<16x128xf32>
    %5 = arith.addf %2, %4 : vector<16x128xf32>
    %6 = vector.extract_strided_slice %5 {offsets = [0, 0], sizes = [8, 128], strides = [1, 1]} : vector<16x128xf32> to vector<8x128xf32>
    %7 = vector.extract_strided_slice %5 {offsets = [8, 0], sizes = [8, 128], strides = [1, 1]} : vector<16x128xf32> to vector<8x128xf32>
    %8 = vector.extract_strided_slice %6 {offsets = [0, 0], sizes = [8, 64], strides = [1, 1]} : vector<8x128xf32> to vector<8x64xf32>
    %9 = vector.extract_strided_slice %7 {offsets = [0, 0], sizes = [8, 64], strides = [1, 1]} : vector<8x128xf32> to vector<8x64xf32>
    %cst_5 = arith.constant dense<0.000000e+00> : vector<8x8xf32>
    %10 = tpu.matmul %9, %8, %cst_5 {dimension_numbers = #tpu.dot_dimension_numbers<[1], [1], [0], [0], [0, 0, 1, 0], [], []>} : vector<8x64xf32>, vector<8x64xf32>, vector<8x8xf32> -> vector<8x8xf32>
    %cst_6 = arith.constant dense<0xFF800000> : vector<8xf32>
    %11 = vector.multi_reduction <maximumf>, %10, %cst_6 [1] : vector<8x8xf32> to vector<8xf32>
    %12 = vector.shape_cast %11 : vector<8xf32> to vector<8x1xf32>
    %13 = vector.broadcast %12 : vector<8x1xf32> to vector<8x8xf32>
    %14 = arith.subf %10, %13 : vector<8x8xf32>
    %15 = math.exp %14 : vector<8x8xf32>
    %cst_7 = arith.constant dense<0.000000e+00> : vector<8xf32>
    %16 = vector.multi_reduction <add>, %15, %cst_7 [1] : vector<8x8xf32> to vector<8xf32>
    %17 = vector.shape_cast %16 : vector<8xf32> to vector<8x1xf32>
    %18 = tpu.reciprocal %17 {approx = true} : vector<8x1xf32> -> vector<8x1xf32>
    %19 = vector.broadcast %18 : vector<8x1xf32> to vector<8x8xf32>
    %20 = arith.mulf %15, %19 : vector<8x8xf32>
    %cst_8 = arith.constant dense<0.000000e+00> : vector<8x64xf32>
    %21 = tpu.matmul %20, %8, %cst_8 {dimension_numbers = #tpu.dot_dimension_numbers<[1], [0], [0], [1], [0, 0, 1, 1], [], []>} : vector<8x8xf32>, vector<8x64xf32>, vector<8x64xf32> -> vector<8x64xf32>
    %c0_9 = arith.constant 0 : index
    %c0_10 = arith.constant 0 : index
    %22 = vector.load %arg3[%c0_9, %c0_10] : memref<64x64xf32, #tpu.memory_space<vmem>>, vector<64x64xf32>
    %cst_11 = arith.constant dense<0.000000e+00> : vector<8x64xf32>
    %23 = tpu.matmul %21, %22, %cst_11 {dimension_numbers = #tpu.dot_dimension_numbers<[1], [0], [0], [1], [0, 0, 1, 1], [], []>} : vector<8x64xf32>, vector<64x64xf32>, vector<8x64xf32> -> vector<8x64xf32>
    %c0_12 = arith.constant 0 : index
    %c0_13 = arith.constant 0 : index
    %24 = vector.load %arg4[%c0_12, %c0_13] : memref<1x64xf32, #tpu.memory_space<vmem>>, vector<1x64xf32>
    %25 = vector.broadcast %24 : vector<1x64xf32> to vector<8x64xf32>
    %26 = arith.addf %23, %25 : vector<8x64xf32>
    %c0_14 = arith.constant 0 : index
    %c0_15 = arith.constant 0 : index
    %27 = vector.load %arg5[%c0_14, %c0_15] : memref<8x128xf32, #tpu.memory_space<vmem>>, vector<8x64xf32>
    tpu.vector_store %arg5[%c0_14, %c0_15], %26 {strides = array<i32>} : memref<8x128xf32, #tpu.memory_space<vmem>>, vector<8x64xf32>,
    %28 = vector.extract_strided_slice %6 {offsets = [0, 64], sizes = [8, 64], strides = [1, 1]} : vector<8x128xf32> to vector<8x64xf32>
    %29 = vector.extract_strided_slice %7 {offsets = [0, 64], sizes = [8, 64], strides = [1, 1]} : vector<8x128xf32> to vector<8x64xf32>
    %cst_16 = arith.constant dense<0.000000e+00> : vector<8x8xf32>
    %30 = tpu.matmul %29, %28, %cst_16 {dimension_numbers = #tpu.dot_dimension_numbers<[1], [1], [0], [0], [0, 0, 1, 0], [], []>} : vector<8x64xf32>, vector<8x64xf32>, vector<8x8xf32> -> vector<8x8xf32>
    %cst_17 = arith.constant dense<0xFF800000> : vector<8xf32>
    %31 = vector.multi_reduction <maximumf>, %30, %cst_17 [1] : vector<8x8xf32> to vector<8xf32>
    %32 = vector.shape_cast %31 : vector<8xf32> to vector<8x1xf32>
    %33 = vector.broadcast %32 : vector<8x1xf32> to vector<8x8xf32>
    %34 = arith.subf %30, %33 : vector<8x8xf32>
    %35 = math.exp %34 : vector<8x8xf32>
    %cst_18 = arith.constant dense<0.000000e+00> : vector<8xf32>
    %36 = vector.multi_reduction <add>, %35, %cst_18 [1] : vector<8x8xf32> to vector<8xf32>
    %37 = vector.shape_cast %36 : vector<8xf32> to vector<8x1xf32>
    %38 = tpu.reciprocal %37 {approx = true} : vector<8x1xf32> -> vector<8x1xf32>
    %39 = vector.broadcast %38 : vector<8x1xf32> to vector<8x8xf32>
    %40 = arith.mulf %35, %39 : vector<8x8xf32>
    %cst_19 = arith.constant dense<0.000000e+00> : vector<8x64xf32>
    %41 = tpu.matmul %40, %28, %cst_19 {dimension_numbers = #tpu.dot_dimension_numbers<[1], [0], [0], [1], [0, 0, 1, 1], [], []>} : vector<8x8xf32>, vector<8x64xf32>, vector<8x64xf32> -> vector<8x64xf32>
    %c0_20 = arith.constant 0 : index
    %c0_21 = arith.constant 0 : index
    %42 = vector.load %arg3[%c0_20, %c0_21] : memref<64x64xf32, #tpu.memory_space<vmem>>, vector<64x64xf32>
    %cst_22 = arith.constant dense<0.000000e+00> : vector<8x64xf32>
    %43 = tpu.matmul %41, %42, %cst_22 {dimension_numbers = #tpu.dot_dimension_numbers<[1], [0], [0], [1], [0, 0, 1, 1], [], []>} : vector<8x64xf32>, vector<64x64xf32>, vector<8x64xf32> -> vector<8x64xf32>
    %c0_23 = arith.constant 0 : index
    %c0_24 = arith.constant 0 : index
    %44 = vector.load %arg4[%c0_23, %c0_24] : memref<1x64xf32, #tpu.memory_space<vmem>>, vector<1x64xf32>
    %45 = vector.broadcast %44 : vector<1x64xf32> to vector<8x64xf32>
    %46 = arith.addf %43, %45 : vector<8x64xf32>
    %c0_25 = arith.constant 0 : index
    %c64 = arith.constant 64 : index
    %47 = vector.load %arg5[%c0_25, %c64] : memref<8x128xf32, #tpu.memory_space<vmem>>, vector<8x64xf32>
    tpu.vector_store %arg5[%c0_25, %c64], %46 {strides = array<i32>} : memref<8x128xf32, #tpu.memory_space<vmem>>, vector<8x64xf32>,
    return
  }
}

</mosaic_0001>

<bundles_post_ra>
// kernel: channel_attention_module.1
= control target key start
LH: loop header
LB: loop body
LE: loop exit
PB: predicated region body
PF: predicated region fallthrough
CT: control target
= control target key end

     0   :  { %v336_v2 = vmov 0   ;;  %vm54_vm0 = vcmask 130048   ;;  %vm107_vm1 = vcmask 523264   ;;  %s337_s15 = smov 64   ;;  %vm134_vm2 = vcmask 64512   ;;  %s494_s0 = inlined_call_operand.vmem [shape: f32[144,128], index: 0, kind: input, shape index: {}]   ;;  %s495_s2 = inlined_call_operand.vmem [shape: f32[16,1], index: 2, kind: input, shape index: {}]   ;;  %s496_s1 = inlined_call_operand.vmem [shape: f32[16,144], index: 1, kind: input, shape index: {}]   ;;  %s497_s3 = inlined_call_operand.vmem [shape: f32[64,64], index: 3, kind: input, shape index: {}]   ;;  %s498_s4 = inlined_call_operand.vmem [shape: f32[1,64], index: 4, kind: input, shape index: {}]   ;;  %s499_s5 = inlined_call_operand.vmem [shape: f32[8,128], index: 5, kind: output, shape index: {}]  }
   0x1   :  { %v39_v0 = vld [vmem:[%s494_s0 + $0x78] sm:$0xff]  ;;  %v38_v1 = vld [vmem:[%s494_s0 + $0x70] sm:$0xff]  ;;  %325 = vset.pattern.permute.xlu0 %v336_v2  ;;  %v37_v3 = vld [vmem:[%s494_s0 + $0x68] sm:$0xff]  ;;  %vm307_vm3 = vcmask 1048064  }
   0x2   :  { %61 = vmatpush.msra.mxu0 %v39_v0  ;;  %v36_v4 = vld [vmem:[%s494_s0 + $0x60] sm:$0xff]  ;;  %v35_v5 = vld [vmem:[%s494_s0 + $0x58] sm:$0xff]  ;;  %v41_v6 = vld [vmem:[%s494_s0 + $0x88] sm:$0xff] }
   0x3   :  { %98 = vmatpush.msra.mxu1 %v41_v6  ;;  %v40_v7 = vld [vmem:[%s494_s0 + $0x80] sm:$0xff]  ;;  %v21_v8 = vld [vmem:[%s496_s1 + $0x8] sm:$0xff]  ;;  %v34_v10 = vld [vmem:[%s494_s0 + $0x50] sm:$0xff] }
   0x4   :  { %62 = vmatpush.msra.mxu0 %v38_v1  ;;  %v42_v9 = vld [vmem:[%s495_s2] sm:$0xff]  ;;  %v33_v11 = vld [vmem:[%s494_s0 + $0x48] sm:$0xff]  ;;  %v31_v14 = vld [vmem:[%s494_s0 + $0x38] sm:$0xff] }
   0x5   :  { %46 = vperm.xlu0 %325, %v42_v9   ;;  %99 = vmatpush.msra.mxu1 %v40_v7  ;;  %v32_v12 = vld [vmem:[%s494_s0 + $0x40] sm:$0xff]  ;;  %v43_v13 = vld [vmem:[%s495_s2 + $0x8] sm:$0xff]  ;;  %v23_v15 = vld [vmem:[%s496_s1 + $0x18] sm:$0xff] }
   0x6   :  { %63 = vmatpush.msra.mxu0 %v37_v3  ;;  %313 = vmatmul.msk.f32.vlgmr.msra.gmra.mxu1 %vm54_vm0, %v21_v8  ;;  %v30_v16 = vld [vmem:[%s494_s0 + $0x30] sm:$0xff]  ;;  %v29_v17 = vld [vmem:[%s494_s0 + $0x28] sm:$0xff]  ;;  %v28_v18 = vld [vmem:[%s494_s0 + $0x20] sm:$0xff] }
   0x7   :  { %v27_v19 = vld [vmem:[%s494_s0 + $0x18] sm:$0xff]  ;;  %v26_v20 = vld [vmem:[%s494_s0 + $0x10] sm:$0xff]  ;;  %v25_v21 = vld [vmem:[%s494_s0 + $0x8] sm:$0xff] }
   0x8   :  { %64 = vmatpush.msra.mxu0 %v36_v4  ;;  %v24_v22 = vld [vmem:[%s494_s0] sm:$0xff]  ;;  %v22_v24 = vld [vmem:[%s496_s1 + $0x10] sm:$0xff]  ;;  %v275_v51 = vld [vmem:[%s497_s3 + $0x38] sm:$0xff] }
   0x9   :  { %v20_v23 = vld [vmem:[%s496_s1] sm:$0xff]  ;;  %v274_v52 = vld [vmem:[%s497_s3 + $0x30] sm:$0xff]  ;;  %v273_v53 = vld [vmem:[%s497_s3 + $0x28] sm:$0xff] }
   0xa   :  { %65 = vmatpush.msra.mxu0 %v35_v5  ;;  %v272_v54 = vld [vmem:[%s497_s3 + $0x20] sm:$0xff]  ;;  %v271_v55 = vld [vmem:[%s497_s3 + $0x18] sm:$0xff]  ;;  %v270_v56 = vld [vmem:[%s497_s3 + $0x10] sm:$0xff] }
   0xb   :  { %v269_v57 = vld [vmem:[%s497_s3 + $0x8] sm:$0xff]  ;;  %v268_v0 = vld [vmem:[%s497_s3] sm:$0xff] }
   0xc   :  { %66 = vmatpush.msra.mxu0 %v34_v10  ;;  %v326_v3 = vld [vmem:[%s498_s4] ss:$0 sm:$0xff] }
   0xd   :  { %51 = vperm.xlu0 %325, %v43_v13   ;;  %v327_v6 = vld [vmem:[%s498_s4] ss:$0 sm:$0xff] }
   0xe   :  { %67 = vmatpush.msra.mxu0 %v33_v11  ;;  %314 = vmatmul.msk.f32.gmra.mxu1 %vm54_vm0, %v23_v15 }
  0x10   :  { %68 = vmatpush.msra.mxu0 %v32_v12 }
  0x12   :  { %69 = vmatpush.msra.mxu0 %v31_v14 }
  0x14   :  { %70 = vmatpush.msra.mxu0 %v30_v16 }
  0x16   :  { %71 = vmatpush.msra.mxu0 %v29_v17 }
  0x18   :  { %72 = vmatpush.msra.mxu0 %v28_v18 }
  0x1a   :  { %73 = vmatpush.msra.mxu0 %v27_v19 }
  0x1c   :  { %74 = vmatpush.msra.mxu0 %v26_v20 }
  0x1e   :  { %75 = vmatpush.msra.mxu0 %v25_v21 }
  0x20   :  { %76 = vmatpush.msra.mxu0 %v24_v22 }
  0x21   :  { %77 = vmatmul.f32.vlgmr.msra.gmra.mxu0 %v20_v23 }
  0x29   :  { %80 = vmatmul.f32.gmra.mxu0 %v22_v24 }
  0x77   :  { %v47_v25 = vpop.permute.xlu0 %46 }
  0x7f   :  { %v52_v30 = vpop.permute.xlu0 %51 }
  0x83   :  { %v101_v26 = vpop.f32.mrf.mxu1 }
  0x8b   :  { %v104_v32 = vpop.f32.mrf.mxu1 }
  0x9e   :  { %v78_v27 = vpop.f32.mrf.mxu0 }
  0x9f   :  { %v79_v28 = vadd.f32 %v78_v27, %v47_v25 }
  0xa1   :  { %v102_v29 = vadd.f32 %v101_v26, %v79_v28 }
  0xa3   :  { %207 = vrot.lane.b32.xlu1 %v102_v29, %s337_s15  ;;  %315 = vmatpush.xpose.msk.msra.mxu2 %vm107_vm1, %v102_v29 }
  0xa4   :  { %164 = vmatpush.msra.mxu3 %v102_v29 }
  0xa6   :  { %v81_v31 = vpop.f32.mrf.mxu0  ;;  %192 = vmatpush.msrb.mxu3 %v275_v51 }
  0xa7   :  { %v82_v33 = vadd.f32 %v81_v31, %v52_v30 }
  0xa8   :  { %193 = vmatpush.msrb.mxu3 %v274_v52 }
  0xa9   :  { %v105_v34 = vadd.f32 %v104_v32, %v82_v33 }
  0xaa   :  { %194 = vmatpush.msrb.mxu3 %v273_v53 }
  0xab   :  { %205 = vrot.lane.b32.xlu1 %v105_v34, %s337_s15  ;;  %316 = vmatmul.msk.f32.vlgmr.msra.gmra.mxu2 %vm107_vm1, %v105_v34 }
  0xac   :  { %195 = vmatpush.msrb.mxu3 %v272_v54 }
  0xae   :  { %196 = vmatpush.msrb.mxu3 %v271_v55 }
  0xb0   :  { %197 = vmatpush.msrb.mxu3 %v270_v56 }
  0xb2   :  { %198 = vmatpush.msrb.mxu3 %v269_v57 }
  0xb4   :  { %199 = vmatpush.msrb.mxu3 %v268_v0 }
 0x115   :  { %v208_v35 = vpop.permute.xlu1 %207 }
 0x116   :  { %319 = vmatpush.xpose.msk.msrb.mxu2 %vm107_vm1, %v208_v35  ;;  %263 = vmatpush.msrb.mxu1 %v208_v35 }
 0x11a   :  { %291 = vmatpush.msra.mxu2 %v275_v51 }
 0x11c   :  { %292 = vmatpush.msra.mxu2 %v274_v52 }
 0x11d   :  { %v206_v36 = vpop.permute.xlu1 %205 }
 0x11e   :  { %320 = vmatmul.msk.f32.vlgmr.msrb.gmra.mxu2 %vm107_vm1, %v206_v36 }
 0x11f   :  { %293 = vmatpush.msra.mxu2 %v273_v53 }
 0x121   :  { %294 = vmatpush.msra.mxu2 %v272_v54 }
 0x123   :  { %295 = vmatpush.msra.mxu2 %v271_v55 }
 0x125   :  { %296 = vmatpush.msra.mxu2 %v270_v56 }
 0x127   :  { %297 = vmatpush.msra.mxu2 %v269_v57 }
 0x129   :  { %298 = vmatpush.msra.mxu2 %v268_v0 }
 0x12e   :  { %v131_v37 = vpop.f32.mrf.mxu2 }
 0x12f   :  { %v135_v40 = vsel %vm134_vm2, %v131_v37, -inf }
 0x1a1   :  { %v230_v38 = vpop.f32.mrf.mxu2 }
 0x1a2   :  { %v233_v39 = vsel %vm134_vm2, %v230_v38, -inf }
 0x1a3   :  { %234 = vmax.xlane.f32.xlu2 %v233_v39 }
 0x1ab   :  { %136 = vmax.xlane.f32.xlu2 %v135_v40 }
 0x216   :  { %v235_v41 = vpop.xlane.xlu2 %234 }
 0x217   :  { %v236_v42 = vsub.f32 %v230_v38, %v235_v41 }
 0x219   :  { %v237_v43 = vmul.f32 1.442695, %v236_v42 }
 0x21b   :  { %328 = vpow2.f32 %v237_v43 }
 0x21e   :  { %v137_v44 = vpop.xlane.xlu2 %136 }
 0x21f   :  { %v138_v45 = vsub.f32 %v131_v37, %v137_v44 }
 0x221   :  { %v329_v46 = vpop.eup %328  ;;  %v139_v47 = vmul.f32 1.442695, %v138_v45 }
 0x222   :  { %v239_v48 = vsel %vm134_vm2, %v329_v46, 0.0 }
 0x223   :  { %330 = vpow2.f32 %v139_v47  ;;  %240 = vadd.xlane.f32.xlu0 %v239_v48 }
 0x229   :  { %v331_v49 = vpop.eup %330 }
 0x22a   :  { %v141_v50 = vsel %vm134_vm2, %v331_v49, 0.0 }
 0x22b   :  { %142 = vadd.xlane.f32.xlu1 %v141_v50 }
 0x296   :  { %v241_v58 = vpop.xlane.xlu0 %240 }
 0x297   :  { %332 = vrcp.f32 %v241_v58 }
 0x29d   :  { %v333_v59 = vpop.eup %332 }
 0x29e   :  { %v243_v60 = vmul.f32 %v333_v59, %v329_v46  ;;  %v143_v61 = vpop.xlane.xlu1 %142 }
 0x29f   :  { %334 = vrcp.f32 %v143_v61 }
 0x2a0   :  { %321 = vmatmul.msk.f32.vlgmr.msrb.gmra.mxu1 %vm134_vm2, %v243_v60 }
 0x2a5   :  { %v335_v62 = vpop.eup %334 }
 0x2a6   :  { %v145_v63 = vmul.f32 %v335_v62, %v331_v49 }
 0x2a8   :  { %317 = vmatmul.msk.f32.vlgmr.msra.gmra.mxu3 %vm134_vm2, %v145_v63 }
 0x31d   :  { %v265_v1 = vpop.f32.mrf.mxu1 }
 0x31e   :  { %322 = vmatmul.msk.f32.vlgmr.msra.gmra.mxu2 %vm107_vm1, %v265_v1 }
 0x32b   :  { %v166_v2 = vpop.f32.mrf.mxu3 }
 0x32c   :  { %318 = vmatmul.msk.f32.vlgmr.msrb.gmra.mxu3 %vm107_vm1, %v166_v2 }
 0x3a1   :  { %v300_v4 = vpop.f32.mrf.mxu2 }
 0x3a2   :  { %v301_v5 = vadd.f32 %v326_v3, %v300_v4 }
 0x3a4   :  { %304 = vrot.lane.b32.xlu2 %v301_v5, %s337_s15 }
 0x3af   :  { %v201_v7 = vpop.f32.mrf.mxu3 }
 0x3b0   :  { %v202_v8 = vadd.f32 %v327_v6, %v201_v7 }
 0x3b2   :  { %204 = vst.msk [vmem:[%s499_s5] sm:$0xff] %vm107_vm1, %v202_v8 }
 0x3fe   :  { %v305_v9 = vpop.permute.xlu2 %304 }
 0x3ff   :  { %308 = vst.msk [vmem:[%s499_s5] sm:$0xff] %vm307_vm3, %v305_v9 }

</bundles_post_ra>
